<compile_context>
chip_gen: v7x
topology: tpu7x:2x2x1
jax: 0.10.0
libtpu: 0.0.40
codegen_flags: <defaults>
</compile_context>

<pallas_src>
import functools

import jax
import jax.numpy as jnp
from jax import lax
from jax.experimental import pallas as pl
from jax.experimental.pallas import tpu as pltpu


def _round_up(x, m):
    return (x + m - 1) // m * m


def _cdiv(a, b):
    return (a + b - 1) // b


def _gru_kernel(x_ref, wi_ref, bi_ref, whzr_ref, whh_ref, h0_ref,
                z_ref, r_ref, h_ref, hfin_ref, h_carry,
                *, compute_dtype, seq_len, t_chunk):
    """One (row-tile, time-chunk) grid step of the GRU recurrence.

    x_ref    : (Tc, Nt, E)    embedded inputs for this chunk (compute_dtype)
    wi_ref   : (E, 3*Hp)      [W_iu | W_ir | W_ih], zero-padded (compute_dtype)
    bi_ref   : (1, 3*Hp)      [b_u | b_r | b_h], zero-padded (f32)
    whzr_ref : (Hp, 2*Hp)     [W_hu | W_hr] (compute_dtype)
    whh_ref  : (Hp, Hp)       W_hh (compute_dtype)
    h0_ref   : (Nt, Hp)       initial hidden state (f32)
    z/r/h_ref: (Tc, Nt, Hp)   per-step gate / hidden histories (history dtype)
    hfin_ref : (Nt, Hp)       final hidden state (f32), written on last chunk
    h_carry  : VMEM scratch (Nt, Hp) f32 carrying h across time chunks
    """
    tc = pl.program_id(1)
    n_tc = pl.num_programs(1)
    Hp = whh_ref.shape[1]

    @pl.when(tc == 0)
    def _():
        h_carry[...] = h0_ref[...]

    # Weights stay resident in VMEM; loaded once per grid step.
    w_i = wi_ref[...]
    b_i = bi_ref[...]
    w_hzr = whzr_ref[...]
    w_hh = whh_ref[...]

    needs_mask = (seq_len % t_chunk) != 0
    t0 = tc * t_chunk

    def step(t, h):
        x_t = x_ref[t]                                            # (Nt, E)
        # Fused input projection for all three gates (biases folded in).
        xp = jnp.dot(x_t, w_i, preferred_element_type=jnp.float32) + b_i
        # Fused recurrent projection for the z and r gates.
        hzr = jnp.dot(h.astype(compute_dtype), w_hzr,
                      preferred_element_type=jnp.float32)         # (Nt, 2*Hp)
        z = jax.nn.sigmoid(xp[:, :Hp] + hzr[:, :Hp])
        r = jax.nn.sigmoid(xp[:, Hp:2 * Hp] + hzr[:, Hp:])
        h_tilde = jnp.tanh(
            xp[:, 2 * Hp:]
            + jnp.dot((r * h).astype(compute_dtype), w_hh,
                      preferred_element_type=jnp.float32))
        h_new = (1.0 - z) * h + z * h_tilde                       # module's convention
        if needs_mask:
            # Padded timesteps (beyond seq_len) must not advance h.
            keep = ((t0 + t) < seq_len).astype(h.dtype)
            h_new = keep * h_new + (1.0 - keep) * h
        z_ref[t] = z.astype(z_ref.dtype)
        r_ref[t] = r.astype(r_ref.dtype)
        h_ref[t] = h_new.astype(h_ref.dtype)
        return h_new

    h_last = lax.fori_loop(0, t_chunk, step, h_carry[...], unroll=True)
    h_carry[...] = h_last

    @pl.when(tc == n_tc - 1)
    def _():
        hfin_ref[...] = h_last


@functools.partial(jax.jit,
                   static_argnames=("compute_dtype", "history_dtype", "t_chunk"))
def gated_gru_forward(x_tokens, init_state, params,
                      compute_dtype=jnp.bfloat16,
                      history_dtype=jnp.bfloat16,
                      t_chunk=None):
    """x_tokens: (B, T, F) int tokens, init_state: (H,) f32.

    Returns (output (B*F, O) f32, h_final (B*F, H) f32,
             (z_hist, r_hist, h_hist) each (T, B*F, H) in history_dtype).
    """
    B, T, F = x_tokens.shape
    E = params["embedding"].shape[1]
    H = params["W_iu"].shape[1]
    N = B * F

    f32 = jnp.float32
    Hp = _round_up(H, 128)                      # lane-dense hidden width

    # Row tiling: <=128 rows (fits v5e default VMEM & its 4x128 MXU) and try to
    # produce >=2 row tiles so the "parallel" axis can use v7x's 2nd TensorCore.
    Nt = max(8, min(128, _round_up(_cdiv(N, 2), 8)))
    Np = _round_up(N, Nt)

    # Time chunking: stream the sequence through VMEM in chunks of Tc steps.
    Tc = min(T, 16) if t_chunk is None else max(1, min(int(t_chunk), T))
    Tp = _round_up(T, Tc)
    n_tc = Tp // Tc

    is_f32 = jnp.dtype(compute_dtype) == jnp.dtype(jnp.float32)
    prec = jax.lax.Precision.HIGHEST if is_f32 else jax.lax.Precision.DEFAULT

    # ---- XLA side: embedding gather only (projection is fused into kernel) --
    emb = params["embedding"][x_tokens]                         # (B, T, F, E)
    x_rows = jnp.transpose(emb, (1, 0, 2, 3)).reshape(T, N, E)
    x_pad = jnp.zeros((Tp, Np, E), compute_dtype)
    x_pad = x_pad.at[:T, :N, :].set(x_rows.astype(compute_dtype))

    # Lane-dense packing: each gate gets its own Hp-wide slot (zero padding in
    # the slack lanes keeps padded hidden lanes at exactly 0 through the loop;
    # padded z/r lanes settle at 0.5 but are sliced away before returning).
    w_icat = jnp.zeros((E, 3 * Hp), f32)
    w_icat = w_icat.at[:, 0:H].set(params["W_iu"])
    w_icat = w_icat.at[:, Hp:Hp + H].set(params["W_ir"])
    w_icat = w_icat.at[:, 2 * Hp:2 * Hp + H].set(params["W_ih"])
    w_icat = w_icat.astype(compute_dtype)

    b_icat = jnp.zeros((1, 3 * Hp), f32)
    b_icat = b_icat.at[0, 0:H].set(params["b_u"])
    b_icat = b_icat.at[0, Hp:Hp + H].set(params["b_r"])
    b_icat = b_icat.at[0, 2 * Hp:2 * Hp + H].set(params["b_h"])

    w_hzr = jnp.zeros((Hp, 2 * Hp), f32)
    w_hzr = w_hzr.at[:H, 0:H].set(params["W_hu"])
    w_hzr = w_hzr.at[:H, Hp:Hp + H].set(params["W_hr"])
    w_hzr = w_hzr.astype(compute_dtype)

    w_hh = jnp.zeros((Hp, Hp), f32).at[:H, :H].set(params["W_hh"])
    w_hh = w_hh.astype(compute_dtype)

    h0_pad = jnp.zeros((Np, Hp), f32).at[:N, :H].set(
        jnp.broadcast_to(init_state.astype(f32), (N, H)))

    # ---- Pallas kernel: the serial recurrence, streamed over time chunks ----
    grid_spec = pltpu.PrefetchScalarGridSpec(
        num_scalar_prefetch=0,
        grid=(Np // Nt, n_tc),
        in_specs=[
            pl.BlockSpec((Tc, Nt, E), lambda r, t: (t, r, 0)),     # x chunk
            pl.BlockSpec((E, 3 * Hp), lambda r, t: (0, 0)),        # [W_iu|W_ir|W_ih]
            pl.BlockSpec((1, 3 * Hp), lambda r, t: (0, 0)),        # biases
            pl.BlockSpec((Hp, 2 * Hp), lambda r, t: (0, 0)),       # [W_hu|W_hr]
            pl.BlockSpec((Hp, Hp), lambda r, t: (0, 0)),           # W_hh
            pl.BlockSpec((Nt, Hp), lambda r, t: (r, 0)),           # h0
        ],
        out_specs=[
            pl.BlockSpec((Tc, Nt, Hp), lambda r, t: (t, r, 0)),    # z history
            pl.BlockSpec((Tc, Nt, Hp), lambda r, t: (t, r, 0)),    # r history
            pl.BlockSpec((Tc, Nt, Hp), lambda r, t: (t, r, 0)),    # h history
            pl.BlockSpec((Nt, Hp), lambda r, t: (r, 0)),           # final h
        ],
        scratch_shapes=[pltpu.VMEM((Nt, Hp), f32)],                # h carry
    )
    out_shape = (
        jax.ShapeDtypeStruct((Tp, Np, Hp), history_dtype),
        jax.ShapeDtypeStruct((Tp, Np, Hp), history_dtype),
        jax.ShapeDtypeStruct((Tp, Np, Hp), history_dtype),
        jax.ShapeDtypeStruct((Np, Hp), f32),
    )
    z_hist, r_hist, h_hist, h_fin = pl.pallas_call(
        functools.partial(_gru_kernel, compute_dtype=compute_dtype,
                          seq_len=T, t_chunk=Tc),
        out_shape=out_shape,
        grid_spec=grid_spec,
        compiler_params=pltpu.CompilerParams(
            dimension_semantics=("parallel", "arbitrary")),
    )(x_pad, w_icat, b_icat, w_hzr, w_hh, h0_pad)

    # ---- XLA side: decoder (runs once, after the last timestep) -------------
    h_final = h_fin[:N, :H]
    output = jnp.dot(h_final.astype(compute_dtype),
                     params["W_dec_t"].astype(compute_dtype),
                     precision=prec,
                     preferred_element_type=f32) + params["b_dec"]

    return (output, h_final,
            (z_hist[:T, :N, :H], r_hist[:T, :N, :H], h_hist[:T, :N, :H]))


# --------------------------- params & reference ------------------------------

def _xavier_uniform(key, shape):
    bound = (6.0 / (shape[0] + shape[1])) ** 0.5
    return jax.random.uniform(key, shape, jnp.float32, -bound, bound)


def init_params(key, input_size, embedding_size, hidden_size, output_size):
    ks = jax.random.split(key, 8)
    E, H, O = embedding_size, hidden_size, output_size
    return {
        "embedding": _xavier_uniform(ks[0], (input_size, E)),
        "W_iu": _xavier_uniform(ks[1], (E, H)),
        "W_hu": _xavier_uniform(ks[2], (H, H)),
        "b_u": jnp.zeros((H,), jnp.float32),
        "W_ir": _xavier_uniform(ks[3], (E, H)),
        "W_hr": _xavier_uniform(ks[4], (H, H)),
        "b_r": jnp.zeros((H,), jnp.float32),
        "W_ih": _xavier_uniform(ks[5], (E, H)),
        "W_hh": _xavier_uniform(ks[6], (H, H)),
        "b_h": jnp.zeros((H,), jnp.float32),
        # nn.Linear(H, O): weight is (O, H); the forward consumes its transpose.
        "W_dec_t": _xavier_uniform(ks[7], (O, H)).T,
        "b_dec": jnp.zeros((O,), jnp.float32),
    }


def reference_forward(x_tokens, init_state, params):
    """Pure-JAX reference mirroring the PyTorch forward exactly."""
    B, T, F = x_tokens.shape
    H = params["W_hu"].shape[0]
    hi = jax.lax.Precision.HIGHEST
    emb = params["embedding"][x_tokens]                    # (B, T, F, E)
    h = init_state.astype(jnp.float32)
    zs, rs, hs = [], [], []
    for t in range(T):
        x_t = emb[:, t]                                    # (B, F, E)
        z = jax.nn.sigmoid(jnp.dot(x_t, params["W_iu"], precision=hi)
                           + jnp.dot(h, params["W_hu"], precision=hi)
                           + params["b_u"])
        r = jax.nn.sigmoid(jnp.dot(x_t, params["W_ir"], precision=hi)
                           + jnp.dot(h, params["W_hr"], precision=hi)
                           + params["b_r"])
        h = (1 - z) * h + z * jnp.tanh(
            jnp.dot(x_t, params["W_ih"], precision=hi)
            + jnp.dot(r * h, params["W_hh"], precision=hi)
            + params["b_h"])
        zs.append(z); rs.append(r); hs.append(h)
    out = (jnp.dot(h.reshape(-1, H), params["W_dec_t"], precision=hi)
           + params["b_dec"])
    return out, h, (zs, rs, hs)


if __name__ == "__main__":
    # Small shapes: vocab=10, batch=2, seq=8, feature=1, embed=16, hidden=32, out=5
    INPUT_SIZE, E, H, O = 10, 16, 32, 5
    B, T, F = 2, 8, 1
    N = B * F

    key = jax.random.PRNGKey(0)
    pkey, xkey, bkey = jax.random.split(key, 3)
    params = init_params(pkey, INPUT_SIZE, E, H, O)
    # Non-zero biases so the fused-bias path is actually exercised.
    bks = jax.random.split(bkey, 4)
    params["b_u"] = 0.1 * jax.random.normal(bks[0], (H,), jnp.float32)
    params["b_r"] = 0.1 * jax.random.normal(bks[1], (H,), jnp.float32)
    params["b_h"] = 0.1 * jax.random.normal(bks[2], (H,), jnp.float32)
    params["b_dec"] = 0.1 * jax.random.normal(bks[3], (O,), jnp.float32)

    x_tokens = jax.random.randint(xkey, (B, T, F), 0, INPUT_SIZE)
    init_state = jnp.zeros((H,), jnp.float32)              # module's init_hidden()

    ref_out, ref_h, (ref_z, ref_r, ref_hs) = reference_forward(
        x_tokens, init_state, params)

    # --- Tight check: f32 everywhere, t_chunk=3 exercises the time-chunk carry
    #     AND the tail-step masking (Tp=9 > T=8). ---------------------------
    out, h_fin, (z_all, r_all, h_all) = gated_gru_forward(
        x_tokens, init_state, params,
        compute_dtype=jnp.float32, history_dtype=jnp.float32, t_chunk=3)
    jax.block_until_ready((out, h_fin, z_all, r_all, h_all))
    assert jnp.allclose(out, ref_out, atol=5e-4), "decoder output mismatch (f32)"
    assert jnp.allclose(h_fin, ref_h.reshape(N, H), atol=5e-4), "final hidden mismatch (f32)"
    for t in range(T):
        assert jnp.allclose(z_all[t], ref_z[t].reshape(N, H), atol=5e-4)
        assert jnp.allclose(r_all[t], ref_r[t].reshape(N, H), atol=5e-4)
        assert jnp.allclose(h_all[t], ref_hs[t].reshape(N, H), atol=5e-4)

    # --- Default fast path: bf16 MXU operands, bf16 histories, f32 carry. ----
    out_bf, h_bf, (z_bf, r_bf, hs_bf) = gated_gru_forward(
        x_tokens, init_state, params)
    jax.block_until_ready((out_bf, h_bf, z_bf, r_bf, hs_bf))
    assert jnp.allclose(out_bf, ref_out, atol=5e-2), "decoder output mismatch (bf16)"
    assert jnp.allclose(h_bf, ref_h.reshape(N, H), atol=5e-2), "final hidden mismatch (bf16)"
    for t in range(T):
        assert jnp.allclose(z_bf[t].astype(jnp.float32), ref_z[t].reshape(N, H), atol=5e-2)
        assert jnp.allclose(r_bf[t].astype(jnp.float32), ref_r[t].reshape(N, H), atol=5e-2)
        assert jnp.allclose(hs_bf[t].astype(jnp.float32), ref_hs[t].reshape(N, H), atol=5e-2)

    print("KERNEL_OK")
</pallas_src>

<mosaic_0001>
module attributes {stable_mosaic.version = 11 : i64} {
  func.func @_gru_kernel(%arg0: i32, %arg1: i32, %arg2: memref<3x8x16xf32, #tpu.memory_space<vmem>>, %arg3: memref<16x384xf32, #tpu.memory_space<vmem>>, %arg4: memref<1x384xf32, #tpu.memory_space<vmem>>, %arg5: memref<128x256xf32, #tpu.memory_space<vmem>>, %arg6: memref<128x128xf32, #tpu.memory_space<vmem>>, %arg7: memref<8x128xf32, #tpu.memory_space<vmem>>, %arg8: memref<3x8x128xf32, #tpu.memory_space<vmem>>, %arg9: memref<3x8x128xf32, #tpu.memory_space<vmem>>, %arg10: memref<3x8x128xf32, #tpu.memory_space<vmem>>, %arg11: memref<8x128xf32, #tpu.memory_space<vmem>>, %arg12: memref<8x128xf32, #tpu.memory_space<vmem>>) attributes {dimension_semantics = [#tpu.dimension_semantics<parallel>, #tpu.dimension_semantics<arbitrary>], iteration_bounds = array<i64: 1, 3>, scalar_prefetch = 0 : i64, scratch_operands = 1 : i64, tpu.core_type = #tpu.core_type<tc>, window_params = [{transform_indices = @transform_0, window_bounds = array<i64: 3, 8, 16>}, {pipeline_mode = #tpu.pipeline_mode<synchronous>, transform_indices = @transform_1, window_bounds = array<i64: 16, 384>}, {pipeline_mode = #tpu.pipeline_mode<synchronous>, transform_indices = @transform_2, window_bounds = array<i64: 1, 384>}, {pipeline_mode = #tpu.pipeline_mode<synchronous>, transform_indices = @transform_3, window_bounds = array<i64: 128, 256>}, {pipeline_mode = #tpu.pipeline_mode<synchronous>, transform_indices = @transform_4, window_bounds = array<i64: 128, 128>}, {transform_indices = @transform_5, window_bounds = array<i64: 8, 128>}, {transform_indices = @transform_6, window_bounds = array<i64: 3, 8, 128>}, {transform_indices = @transform_7, window_bounds = array<i64: 3, 8, 128>}, {transform_indices = @transform_8, window_bounds = array<i64: 3, 8, 128>}, {transform_indices = @transform_9, window_bounds = array<i64: 8, 128>}]} {
    %c0_i32 = arith.constant 0 : i32
    %0 = arith.cmpi eq, %arg1, %c0_i32 : i32
    %1 = arith.extui %0 : i1 to i32
    %c0_i32_0 = arith.constant 0 : i32
    %2 = arith.cmpi ne, %1, %c0_i32_0 : i32
    scf.if %2 {
      %c0_62 = arith.constant 0 : index
      %c0_63 = arith.constant 0 : index
      %178 = vector.load %arg7[%c0_62, %c0_63] : memref<8x128xf32, #tpu.memory_space<vmem>>, vector<8x128xf32>
      %c0_64 = arith.constant 0 : index
      %c0_65 = arith.constant 0 : index
      %179 = vector.load %arg12[%c0_64, %c0_65] : memref<8x128xf32, #tpu.memory_space<vmem>>, vector<8x128xf32>
      tpu.vector_store %arg12[%c0_64, %c0_65], %178 {strides = array<i32>} : memref<8x128xf32, #tpu.memory_space<vmem>>, vector<8x128xf32>,
    } else {
    }
    %c0 = arith.constant 0 : index
    %c0_1 = arith.constant 0 : index
    %3 = vector.load %arg3[%c0, %c0_1] : memref<16x384xf32, #tpu.memory_space<vmem>>, vector<16x384xf32>
    %c0_2 = arith.constant 0 : index
    %c0_3 = arith.constant 0 : index
    %4 = vector.load %arg4[%c0_2, %c0_3] : memref<1x384xf32, #tpu.memory_space<vmem>>, vector<1x384xf32>
    %c0_4 = arith.constant 0 : index
    %c0_5 = arith.constant 0 : index
    %5 = vector.load %arg5[%c0_4, %c0_5] : memref<128x256xf32, #tpu.memory_space<vmem>>, vector<128x256xf32>
    %c0_6 = arith.constant 0 : index
    %c0_7 = arith.constant 0 : index
    %6 = vector.load %arg6[%c0_6, %c0_7] : memref<128x128xf32, #tpu.memory_space<vmem>>, vector<128x128xf32>
    %c3_i32 = arith.constant 3 : i32
    %7 = arith.muli %arg1, %c3_i32 : i32
    %c0_8 = arith.constant 0 : index
    %c0_9 = arith.constant 0 : index
    %8 = vector.load %arg12[%c0_8, %c0_9] : memref<8x128xf32, #tpu.memory_space<vmem>>, vector<8x128xf32>
    %c0_i32_10 = arith.constant 0 : i32
    %9 = arith.index_cast %c0_i32_10 : i32 to index
    %c0_11 = arith.constant 0 : index
    %c0_12 = arith.constant 0 : index
    %10 = vector.load %arg2[%9, %c0_11, %c0_12] : memref<3x8x16xf32, #tpu.memory_space<vmem>>, vector<1x8x16xf32>
    %11 = vector.shape_cast %10 : vector<1x8x16xf32> to vector<8x16xf32>
    %cst = arith.constant dense<0.000000e+00> : vector<8x384xf32>
    %12 = tpu.matmul %11, %3, %cst {dimension_numbers = #tpu.dot_dimension_numbers<[1], [0], [0], [1], [0, 0, 1, 1], [], []>} : vector<8x16xf32>, vector<16x384xf32>, vector<8x384xf32> -> vector<8x384xf32>
    %13 = vector.broadcast %4 : vector<1x384xf32> to vector<8x384xf32>
    %14 = arith.addf %12, %13 : vector<8x384xf32>
    %cst_13 = arith.constant dense<0.000000e+00> : vector<8x256xf32>
    %15 = tpu.matmul %8, %5, %cst_13 {dimension_numbers = #tpu.dot_dimension_numbers<[1], [0], [0], [1], [0, 0, 1, 1], [], []>} : vector<8x128xf32>, vector<128x256xf32>, vector<8x256xf32> -> vector<8x256xf32>
    %16 = vector.extract_strided_slice %14 {offsets = [0, 0], sizes = [8, 128], strides = [1, 1]} : vector<8x384xf32> to vector<8x128xf32>
    %17 = vector.extract_strided_slice %15 {offsets = [0, 0], sizes = [8, 128], strides = [1, 1]} : vector<8x256xf32> to vector<8x128xf32>
    %18 = arith.addf %16, %17 : vector<8x128xf32>
    %19 = arith.negf %18 : vector<8x128xf32>
    %20 = math.exp %19 : vector<8x128xf32>
    %cst_14 = arith.constant 1.000000e+00 : f32
    %21 = vector.broadcast %cst_14 : f32 to vector<8x128xf32>
    %22 = arith.addf %21, %20 : vector<8x128xf32>
    %23 = arith.divf %21, %22 : vector<8x128xf32>
    %24 = vector.extract_strided_slice %14 {offsets = [0, 128], sizes = [8, 128], strides = [1, 1]} : vector<8x384xf32> to vector<8x128xf32>
    %25 = vector.extract_strided_slice %15 {offsets = [0, 128], sizes = [8, 128], strides = [1, 1]} : vector<8x256xf32> to vector<8x128xf32>
    %26 = arith.addf %24, %25 : vector<8x128xf32>
    %27 = arith.negf %26 : vector<8x128xf32>
    %28 = math.exp %27 : vector<8x128xf32>
    %cst_15 = arith.constant 1.000000e+00 : f32
    %29 = vector.broadcast %cst_15 : f32 to vector<8x128xf32>
    %30 = arith.addf %29, %28 : vector<8x128xf32>
    %31 = arith.divf %29, %30 : vector<8x128xf32>
    %32 = vector.extract_strided_slice %14 {offsets = [0, 256], sizes = [8, 128], strides = [1, 1]} : vector<8x384xf32> to vector<8x128xf32>
    %33 = arith.mulf %31, %8 : vector<8x128xf32>
    %cst_16 = arith.constant dense<0.000000e+00> : vector<8x128xf32>
    %34 = tpu.matmul %33, %6, %cst_16 {dimension_numbers = #tpu.dot_dimension_numbers<[1], [0], [0], [1], [0, 0, 1, 1], [], []>} : vector<8x128xf32>, vector<128x128xf32>, vector<8x128xf32> -> vector<8x128xf32>
    %35 = arith.addf %32, %34 : vector<8x128xf32>
    %36 = math.tanh %35 : vector<8x128xf32>
    %cst_17 = arith.constant 1.000000e+00 : f32
    %37 = vector.broadcast %cst_17 : f32 to vector<8x128xf32>
    %38 = arith.subf %37, %23 : vector<8x128xf32>
    %39 = arith.mulf %38, %8 : vector<8x128xf32>
    %40 = arith.mulf %23, %36 : vector<8x128xf32>
    %41 = arith.addf %39, %40 : vector<8x128xf32>
    %42 = arith.addi %7, %c0_i32_10 : i32
    %c8_i32 = arith.constant 8 : i32
    %43 = arith.cmpi slt, %42, %c8_i32 : i32
    %44 = arith.extui %43 : i1 to i32
    %45 = arith.sitofp %44 : i32 to f32
    %46 = vector.broadcast %45 : f32 to vector<8x128xf32>
    %47 = arith.mulf %46, %41 : vector<8x128xf32>
    %cst_18 = arith.constant 1.000000e+00 : f32
    %48 = arith.subf %cst_18, %45 : f32
    %49 = vector.broadcast %48 : f32 to vector<8x128xf32>
    %50 = arith.mulf %49, %8 : vector<8x128xf32>
    %51 = arith.addf %47, %50 : vector<8x128xf32>
    %52 = arith.index_cast %c0_i32_10 : i32 to index
    %c0_19 = arith.constant 0 : index
    %c0_20 = arith.constant 0 : index
    %53 = vector.load %arg8[%52, %c0_19, %c0_20] : memref<3x8x128xf32, #tpu.memory_space<vmem>>, vector<1x8x128xf32>
    %54 = vector.shape_cast %53 : vector<1x8x128xf32> to vector<8x128xf32>
    %55 = vector.shape_cast %23 : vector<8x128xf32> to vector<1x8x128xf32>
    tpu.vector_store %arg8[%52, %c0_19, %c0_20], %55 {strides = array<i32>} : memref<3x8x128xf32, #tpu.memory_space<vmem>>, vector<1x8x128xf32>,
    %56 = arith.index_cast %c0_i32_10 : i32 to index
    %c0_21 = arith.constant 0 : index
    %c0_22 = arith.constant 0 : index
    %57 = vector.load %arg9[%56, %c0_21, %c0_22] : memref<3x8x128xf32, #tpu.memory_space<vmem>>, vector<1x8x128xf32>
    %58 = vector.shape_cast %57 : vector<1x8x128xf32> to vector<8x128xf32>
    %59 = vector.shape_cast %31 : vector<8x128xf32> to vector<1x8x128xf32>
    tpu.vector_store %arg9[%56, %c0_21, %c0_22], %59 {strides = array<i32>} : memref<3x8x128xf32, #tpu.memory_space<vmem>>, vector<1x8x128xf32>,
    %60 = arith.index_cast %c0_i32_10 : i32 to index
    %c0_23 = arith.constant 0 : index
    %c0_24 = arith.constant 0 : index
    %61 = vector.load %arg10[%60, %c0_23, %c0_24] : memref<3x8x128xf32, #tpu.memory_space<vmem>>, vector<1x8x128xf32>
    %62 = vector.shape_cast %61 : vector<1x8x128xf32> to vector<8x128xf32>
    %63 = vector.shape_cast %51 : vector<8x128xf32> to vector<1x8x128xf32>
    tpu.vector_store %arg10[%60, %c0_23, %c0_24], %63 {strides = array<i32>} : memref<3x8x128xf32, #tpu.memory_space<vmem>>, vector<1x8x128xf32>,
    %c1_i32 = arith.constant 1 : i32
    %64 = arith.index_cast %c1_i32 : i32 to index
    %c0_25 = arith.constant 0 : index
    %c0_26 = arith.constant 0 : index
    %65 = vector.load %arg2[%64, %c0_25, %c0_26] : memref<3x8x16xf32, #tpu.memory_space<vmem>>, vector<1x8x16xf32>
    %66 = vector.shape_cast %65 : vector<1x8x16xf32> to vector<8x16xf32>
    %cst_27 = arith.constant dense<0.000000e+00> : vector<8x384xf32>
    %67 = tpu.matmul %66, %3, %cst_27 {dimension_numbers = #tpu.dot_dimension_numbers<[1], [0], [0], [1], [0, 0, 1, 1], [], []>} : vector<8x16xf32>, vector<16x384xf32>, vector<8x384xf32> -> vector<8x384xf32>
    %68 = vector.broadcast %4 : vector<1x384xf32> to vector<8x384xf32>
    %69 = arith.addf %67, %68 : vector<8x384xf32>
    %cst_28 = arith.constant dense<0.000000e+00> : vector<8x256xf32>
    %70 = tpu.matmul %51, %5, %cst_28 {dimension_numbers = #tpu.dot_dimension_numbers<[1], [0], [0], [1], [0, 0, 1, 1], [], []>} : vector<8x128xf32>, vector<128x256xf32>, vector<8x256xf32> -> vector<8x256xf32>
    %71 = vector.extract_strided_slice %69 {offsets = [0, 0], sizes = [8, 128], strides = [1, 1]} : vector<8x384xf32> to vector<8x128xf32>
    %72 = vector.extract_strided_slice %70 {offsets = [0, 0], sizes = [8, 128], strides = [1, 1]} : vector<8x256xf32> to vector<8x128xf32>
    %73 = arith.addf %71, %72 : vector<8x128xf32>
    %74 = arith.negf %73 : vector<8x128xf32>
    %75 = math.exp %74 : vector<8x128xf32>
    %cst_29 = arith.constant 1.000000e+00 : f32
    %76 = vector.broadcast %cst_29 : f32 to vector<8x128xf32>
    %77 = arith.addf %76, %75 : vector<8x128xf32>
    %78 = arith.divf %76, %77 : vector<8x128xf32>
    %79 = vector.extract_strided_slice %69 {offsets = [0, 128], sizes = [8, 128], strides = [1, 1]} : vector<8x384xf32> to vector<8x128xf32>
    %80 = vector.extract_strided_slice %70 {offsets = [0, 128], sizes = [8, 128], strides = [1, 1]} : vector<8x256xf32> to vector<8x128xf32>
    %81 = arith.addf %79, %80 : vector<8x128xf32>
    %82 = arith.negf %81 : vector<8x128xf32>
    %83 = math.exp %82 : vector<8x128xf32>
    %cst_30 = arith.constant 1.000000e+00 : f32
    %84 = vector.broadcast %cst_30 : f32 to vector<8x128xf32>
    %85 = arith.addf %84, %83 : vector<8x128xf32>
    %86 = arith.divf %84, %85 : vector<8x128xf32>
    %87 = vector.extract_strided_slice %69 {offsets = [0, 256], sizes = [8, 128], strides = [1, 1]} : vector<8x384xf32> to vector<8x128xf32>
    %88 = arith.mulf %86, %51 : vector<8x128xf32>
    %cst_31 = arith.constant dense<0.000000e+00> : vector<8x128xf32>
    %89 = tpu.matmul %88, %6, %cst_31 {dimension_numbers = #tpu.dot_dimension_numbers<[1], [0], [0], [1], [0, 0, 1, 1], [], []>} : vector<8x128xf32>, vector<128x128xf32>, vector<8x128xf32> -> vector<8x128xf32>
    %90 = arith.addf %87, %89 : vector<8x128xf32>
    %91 = math.tanh %90 : vector<8x128xf32>
    %cst_32 = arith.constant 1.000000e+00 : f32
    %92 = vector.broadcast %cst_32 : f32 to vector<8x128xf32>
    %93 = arith.subf %92, %78 : vector<8x128xf32>
    %94 = arith.mulf %93, %51 : vector<8x128xf32>
    %95 = arith.mulf %78, %91 : vector<8x128xf32>
    %96 = arith.addf %94, %95 : vector<8x128xf32>
    %97 = arith.addi %7, %c1_i32 : i32
    %c8_i32_33 = arith.constant 8 : i32
    %98 = arith.cmpi slt, %97, %c8_i32_33 : i32
    %99 = arith.extui %98 : i1 to i32
    %100 = arith.sitofp %99 : i32 to f32
    %101 = vector.broadcast %100 : f32 to vector<8x128xf32>
    %102 = arith.mulf %101, %96 : vector<8x128xf32>
    %cst_34 = arith.constant 1.000000e+00 : f32
    %103 = arith.subf %cst_34, %100 : f32
    %104 = vector.broadcast %103 : f32 to vector<8x128xf32>
    %105 = arith.mulf %104, %51 : vector<8x128xf32>
    %106 = arith.addf %102, %105 : vector<8x128xf32>
    %107 = arith.index_cast %c1_i32 : i32 to index
    %c0_35 = arith.constant 0 : index
    %c0_36 = arith.constant 0 : index
    %108 = vector.load %arg8[%107, %c0_35, %c0_36] : memref<3x8x128xf32, #tpu.memory_space<vmem>>, vector<1x8x128xf32>
    %109 = vector.shape_cast %108 : vector<1x8x128xf32> to vector<8x128xf32>
    %110 = vector.shape_cast %78 : vector<8x128xf32> to vector<1x8x128xf32>
    tpu.vector_store %arg8[%107, %c0_35, %c0_36], %110 {strides = array<i32>} : memref<3x8x128xf32, #tpu.memory_space<vmem>>, vector<1x8x128xf32>,
    %111 = arith.index_cast %c1_i32 : i32 to index
    %c0_37 = arith.constant 0 : index
    %c0_38 = arith.constant 0 : index
    %112 = vector.load %arg9[%111, %c0_37, %c0_38] : memref<3x8x128xf32, #tpu.memory_space<vmem>>, vector<1x8x128xf32>
    %113 = vector.shape_cast %112 : vector<1x8x128xf32> to vector<8x128xf32>
    %114 = vector.shape_cast %86 : vector<8x128xf32> to vector<1x8x128xf32>
    tpu.vector_store %arg9[%111, %c0_37, %c0_38], %114 {strides = array<i32>} : memref<3x8x128xf32, #tpu.memory_space<vmem>>, vector<1x8x128xf32>,
    %115 = arith.index_cast %c1_i32 : i32 to index
    %c0_39 = arith.constant 0 : index
    %c0_40 = arith.constant 0 : index
    %116 = vector.load %arg10[%115, %c0_39, %c0_40] : memref<3x8x128xf32, #tpu.memory_space<vmem>>, vector<1x8x128xf32>
    %117 = vector.shape_cast %116 : vector<1x8x128xf32> to vector<8x128xf32>
    %118 = vector.shape_cast %106 : vector<8x128xf32> to vector<1x8x128xf32>
    tpu.vector_store %arg10[%115, %c0_39, %c0_40], %118 {strides = array<i32>} : memref<3x8x128xf32, #tpu.memory_space<vmem>>, vector<1x8x128xf32>,
    %c2_i32 = arith.constant 2 : i32
    %119 = arith.index_cast %c2_i32 : i32 to index
    %c0_41 = arith.constant 0 : index
    %c0_42 = arith.constant 0 : index
    %120 = vector.load %arg2[%119, %c0_41, %c0_42] : memref<3x8x16xf32, #tpu.memory_space<vmem>>, vector<1x8x16xf32>
    %121 = vector.shape_cast %120 : vector<1x8x16xf32> to vector<8x16xf32>
    %cst_43 = arith.constant dense<0.000000e+00> : vector<8x384xf32>
    %122 = tpu.matmul %121, %3, %cst_43 {dimension_numbers = #tpu.dot_dimension_numbers<[1], [0], [0], [1], [0, 0, 1, 1], [], []>} : vector<8x16xf32>, vector<16x384xf32>, vector<8x384xf32> -> vector<8x384xf32>
    %123 = vector.broadcast %4 : vector<1x384xf32> to vector<8x384xf32>
    %124 = arith.addf %122, %123 : vector<8x384xf32>
    %cst_44 = arith.constant dense<0.000000e+00> : vector<8x256xf32>
    %125 = tpu.matmul %106, %5, %cst_44 {dimension_numbers = #tpu.dot_dimension_numbers<[1], [0], [0], [1], [0, 0, 1, 1], [], []>} : vector<8x128xf32>, vector<128x256xf32>, vector<8x256xf32> -> vector<8x256xf32>
    %126 = vector.extract_strided_slice %124 {offsets = [0, 0], sizes = [8, 128], strides = [1, 1]} : vector<8x384xf32> to vector<8x128xf32>
    %127 = vector.extract_strided_slice %125 {offsets = [0, 0], sizes = [8, 128], strides = [1, 1]} : vector<8x256xf32> to vector<8x128xf32>
    %128 = arith.addf %126, %127 : vector<8x128xf32>
    %129 = arith.negf %128 : vector<8x128xf32>
    %130 = math.exp %129 : vector<8x128xf32>
    %cst_45 = arith.constant 1.000000e+00 : f32
    %131 = vector.broadcast %cst_45 : f32 to vector<8x128xf32>
    %132 = arith.addf %131, %130 : vector<8x128xf32>
    %133 = arith.divf %131, %132 : vector<8x128xf32>
    %134 = vector.extract_strided_slice %124 {offsets = [0, 128], sizes = [8, 128], strides = [1, 1]} : vector<8x384xf32> to vector<8x128xf32>
    %135 = vector.extract_strided_slice %125 {offsets = [0, 128], sizes = [8, 128], strides = [1, 1]} : vector<8x256xf32> to vector<8x128xf32>
    %136 = arith.addf %134, %135 : vector<8x128xf32>
    %137 = arith.negf %136 : vector<8x128xf32>
    %138 = math.exp %137 : vector<8x128xf32>
    %cst_46 = arith.constant 1.000000e+00 : f32
    %139 = vector.broadcast %cst_46 : f32 to vector<8x128xf32>
    %140 = arith.addf %139, %138 : vector<8x128xf32>
    %141 = arith.divf %139, %140 : vector<8x128xf32>
    %142 = vector.extract_strided_slice %124 {offsets = [0, 256], sizes = [8, 128], strides = [1, 1]} : vector<8x384xf32> to vector<8x128xf32>
    %143 = arith.mulf %141, %106 : vector<8x128xf32>
    %cst_47 = arith.constant dense<0.000000e+00> : vector<8x128xf32>
    %144 = tpu.matmul %143, %6, %cst_47 {dimension_numbers = #tpu.dot_dimension_numbers<[1], [0], [0], [1], [0, 0, 1, 1], [], []>} : vector<8x128xf32>, vector<128x128xf32>, vector<8x128xf32> -> vector<8x128xf32>
    %145 = arith.addf %142, %144 : vector<8x128xf32>
    %146 = math.tanh %145 : vector<8x128xf32>
    %cst_48 = arith.constant 1.000000e+00 : f32
    %147 = vector.broadcast %cst_48 : f32 to vector<8x128xf32>
    %148 = arith.subf %147, %133 : vector<8x128xf32>
    %149 = arith.mulf %148, %106 : vector<8x128xf32>
    %150 = arith.mulf %133, %146 : vector<8x128xf32>
    %151 = arith.addf %149, %150 : vector<8x128xf32>
    %152 = arith.addi %7, %c2_i32 : i32
    %c8_i32_49 = arith.constant 8 : i32
    %153 = arith.cmpi slt, %152, %c8_i32_49 : i32
    %154 = arith.extui %153 : i1 to i32
    %155 = arith.sitofp %154 : i32 to f32
    %156 = vector.broadcast %155 : f32 to vector<8x128xf32>
    %157 = arith.mulf %156, %151 : vector<8x128xf32>
    %cst_50 = arith.constant 1.000000e+00 : f32
    %158 = arith.subf %cst_50, %155 : f32
    %159 = vector.broadcast %158 : f32 to vector<8x128xf32>
    %160 = arith.mulf %159, %106 : vector<8x128xf32>
    %161 = arith.addf %157, %160 : vector<8x128xf32>
    %162 = arith.index_cast %c2_i32 : i32 to index
    %c0_51 = arith.constant 0 : index
    %c0_52 = arith.constant 0 : index
    %163 = vector.load %arg8[%162, %c0_51, %c0_52] : memref<3x8x128xf32, #tpu.memory_space<vmem>>, vector<1x8x128xf32>
    %164 = vector.shape_cast %163 : vector<1x8x128xf32> to vector<8x128xf32>
    %165 = vector.shape_cast %133 : vector<8x128xf32> to vector<1x8x128xf32>
    tpu.vector_store %arg8[%162, %c0_51, %c0_52], %165 {strides = array<i32>} : memref<3x8x128xf32, #tpu.memory_space<vmem>>, vector<1x8x128xf32>,
    %166 = arith.index_cast %c2_i32 : i32 to index
    %c0_53 = arith.constant 0 : index
    %c0_54 = arith.constant 0 : index
    %167 = vector.load %arg9[%166, %c0_53, %c0_54] : memref<3x8x128xf32, #tpu.memory_space<vmem>>, vector<1x8x128xf32>
    %168 = vector.shape_cast %167 : vector<1x8x128xf32> to vector<8x128xf32>
    %169 = vector.shape_cast %141 : vector<8x128xf32> to vector<1x8x128xf32>
    tpu.vector_store %arg9[%166, %c0_53, %c0_54], %169 {strides = array<i32>} : memref<3x8x128xf32, #tpu.memory_space<vmem>>, vector<1x8x128xf32>,
    %170 = arith.index_cast %c2_i32 : i32 to index
    %c0_55 = arith.constant 0 : index
    %c0_56 = arith.constant 0 : index
    %171 = vector.load %arg10[%170, %c0_55, %c0_56] : memref<3x8x128xf32, #tpu.memory_space<vmem>>, vector<1x8x128xf32>
    %172 = vector.shape_cast %171 : vector<1x8x128xf32> to vector<8x128xf32>
    %173 = vector.shape_cast %161 : vector<8x128xf32> to vector<1x8x128xf32>
    tpu.vector_store %arg10[%170, %c0_55, %c0_56], %173 {strides = array<i32>} : memref<3x8x128xf32, #tpu.memory_space<vmem>>, vector<1x8x128xf32>,
    %c3_i32_57 = arith.constant 3 : i32
    %c0_58 = arith.constant 0 : index
    %c0_59 = arith.constant 0 : index
    %174 = vector.load %arg12[%c0_58, %c0_59] : memref<8x128xf32, #tpu.memory_space<vmem>>, vector<8x128xf32>
    tpu.vector_store %arg12[%c0_58, %c0_59], %161 {strides = array<i32>} : memref<8x128xf32, #tpu.memory_space<vmem>>, vector<8x128xf32>,
    %c2_i32_60 = arith.constant 2 : i32
    %175 = arith.cmpi eq, %arg1, %c2_i32_60 : i32
    %176 = arith.extui %175 : i1 to i32
    %c0_i32_61 = arith.constant 0 : i32
    %177 = arith.cmpi ne, %176, %c0_i32_61 : i32
    scf.if %177 {
      %c0_62 = arith.constant 0 : index
      %c0_63 = arith.constant 0 : index
      %178 = vector.load %arg11[%c0_62, %c0_63] : memref<8x128xf32, #tpu.memory_space<vmem>>, vector<8x128xf32>
      tpu.vector_store %arg11[%c0_62, %c0_63], %161 {strides = array<i32>} : memref<8x128xf32, #tpu.memory_space<vmem>>, vector<8x128xf32>,
    } else {
    }
    return
  }
  func.func @transform_0(%arg0: i32, %arg1: i32) -> (i32, i32, i32) {
    %c0_i32 = arith.constant 0 : i32
    %c0_i32_0 = arith.constant 0 : i32
    return %arg1, %arg0, %c0_i32 : i32, i32, i32
  }
  func.func @transform_1(%arg0: i32, %arg1: i32) -> (i32, i32) {
    %c0_i32 = arith.constant 0 : i32
    %c0_i32_0 = arith.constant 0 : i32
    %c0_i32_1 = arith.constant 0 : i32
    return %c0_i32, %c0_i32_0 : i32, i32
  }
  func.func @transform_2(%arg0: i32, %arg1: i32) -> (i32, i32) {
    %c0_i32 = arith.constant 0 : i32
    %c0_i32_0 = arith.constant 0 : i32
    %c0_i32_1 = arith.constant 0 : i32
    return %c0_i32, %c0_i32_0 : i32, i32
  }
  func.func @transform_3(%arg0: i32, %arg1: i32) -> (i32, i32) {
    %c0_i32 = arith.constant 0 : i32
    %c0_i32_0 = arith.constant 0 : i32
    %c0_i32_1 = arith.constant 0 : i32
    return %c0_i32, %c0_i32_0 : i32, i32
  }
  func.func @transform_4(%arg0: i32, %arg1: i32) -> (i32, i32) {
    %c0_i32 = arith.constant 0 : i32
    %c0_i32_0 = arith.constant 0 : i32
    %c0_i32_1 = arith.constant 0 : i32
    return %c0_i32, %c0_i32_0 : i32, i32
  }
  func.func @transform_5(%arg0: i32, %arg1: i32) -> (i32, i32) {
    %c0_i32 = arith.constant 0 : i32
    %c0_i32_0 = arith.constant 0 : i32
    return %arg0, %c0_i32 : i32, i32
  }
  func.func @transform_6(%arg0: i32, %arg1: i32) -> (i32, i32, i32) {
    %c0_i32 = arith.constant 0 : i32
    %c0_i32_0 = arith.constant 0 : i32
    return %arg1, %arg0, %c0_i32 : i32, i32, i32
  }
  func.func @transform_7(%arg0: i32, %arg1: i32) -> (i32, i32, i32) {
    %c0_i32 = arith.constant 0 : i32
    %c0_i32_0 = arith.constant 0 : i32
    return %arg1, %arg0, %c0_i32 : i32, i32, i32
  }
  func.func @transform_8(%arg0: i32, %arg1: i32) -> (i32, i32, i32) {
    %c0_i32 = arith.constant 0 : i32
    %c0_i32_0 = arith.constant 0 : i32
    return %arg1, %arg0, %c0_i32 : i32, i32, i32
  }
  func.func @transform_9(%arg0: i32, %arg1: i32) -> (i32, i32) {
    %c0_i32 = arith.constant 0 : i32
    %c0_i32_0 = arith.constant 0 : i32
    return %arg0, %c0_i32 : i32, i32
  }
}

</mosaic_0001>

<bundles_post_ra>
// kernel: gated_gru_forward.1
= control target key start
LH: loop header
LB: loop body
LE: loop exit
PB: predicated region body
PF: predicated region fallthrough
CT: control target
= control target key end

     0   :  { %s2264_s30 = smov 0   ;;  %s2266_s10 = smov 0   ;;  %s2723_s0 = inlined_call_operand.vmem [shape: f32[9,8,16], index: 0, kind: input, shape index: {}]   ;;  %s2724_s1 = inlined_call_operand.vmem [shape: f32[16,384], index: 1, kind: input, shape index: {}]   ;;  %s2725_s2 = inlined_call_operand.vmem [shape: f32[1,384], index: 2, kind: input, shape index: {}]   ;;  %s2726_s3 = inlined_call_operand.vmem [shape: f32[128,256], index: 3, kind: input, shape index: {}]   ;;  %s2727_s4 = inlined_call_operand.vmem [shape: f32[128,128], index: 4, kind: input, shape index: {}]   ;;  %s2728_s5 = inlined_call_operand.vmem [shape: f32[8,128], index: 5, kind: input, shape index: {}]   ;;  %s2729_s6 = inlined_call_operand.vmem [shape: f32[9,8,128], index: 6, kind: output, shape index: {0}]   ;;  %s2730_s7 = inlined_call_operand.vmem [shape: f32[9,8,128], index: 7, kind: output, shape index: {1}]   ;;  %s2731_s8 = inlined_call_operand.vmem [shape: f32[9,8,128], index: 8, kind: output, shape index: {2}]   ;;  %s2732_s9 = inlined_call_operand.vmem [shape: f32[8,128], index: 9, kind: output, shape index: {3}]  }
   0x1   :  { %s2268_s11 = smov 0  }
   0x2 LB: > { %s29_s12 = sadd.s32 1, %s2205_s10  ;;  %p1704_p0 = scmp.ge.s32.totalorder %s2209_s11, 1  ;;  %s2209_s11 = sphi %s2268_s11, %s20_s11   ;;  %s2205_s10 = sphi %s2266_s10, %s2734_s10   ;;  %s2201_s30 = sphi %s2264_s30, %s2733_s30  }
   0x3   : > { %p30_p1 = scmp.ge.s32.totalorder %s29_s12, 3  ;;  %p327_p2 = scmp.lt.s32.totalorder %s2209_s11, 4 }
   0x5   : > { %s2736_s12 = smov (%p30_p1, %s29_s12), 0  ;;  %p328_p3 = pnand %p1704_p0, %p327_p2 }
   0x6   : > { %s2285_s13 = smul.u32 (!%p328_p3), 3, %s2201_s30  ;;  %p1709_p5 = scmp.ne.s32.totalorder (!%p328_p3), %s2201_s30, 0 }
   0x7   : > { %331 = sbr.rel (%p328_p3) target bundleno = 1491 (0x5d3), region = 44 }
   0x8   : > { %p394_p4 = scmp.lt.s32.totalorder (!%p328_p3), %s2285_s13, 8 }
   0xe   : > { %s395_s14 = scalar_select %p394_p4, %s2285_s13, 8 }
   0xf   : > { %440 = sbr.rel (%p1709_p5) target bundleno = 22 (0x16), region = 48  ;;  %v441_v0 = vld [vmem:[%s2728_s5] sm:$0xff] (!%p1709_p5) }
  0x10   : > { %s1705_s15 = sshll.u32 %s395_s14, 3  ;;  %442 = vst [vmem:[#allocation2] sm:$0xff] (!%p1709_p5), %v441_v0 }
  0x11   : > { %s2294_s18 = scalar_lea.vmem %s2723_s0, %s1705_s15  ;;  %s2299_s21 = scalar_lea.vmem %s2729_s6, %s1705_s15 }
  0x12   : > { %s2304_s24 = scalar_lea.vmem %s2730_s7, %s1705_s15  ;;  %s2309_s27 = scalar_lea.vmem %s2731_s8, %s1705_s15 }
  0x16 PF: > { %v444_v1 = vld [vmem:[%s2724_s1 + $0x8] sm:$0xff]  ;;  %v447_v2 = vld [vmem:[%s2724_s1 + $0x20] sm:$0xff]  ;;  %v446_v5 = vld [vmem:[%s2724_s1 + $0x18] sm:$0xff]  ;;  %v2211_v6 = vmov 0.0   ;;  %v2212_v9 = vmov 0.0|0.0   ;;  %vm2213_vm0 = vmmov 0  }
  0x17   : > { %v443_v3 = vld [vmem:[%s2724_s1] sm:$0xff]  ;;  %v2324_v4 = vpack.c.bf16 %v447_v2, %v444_v1  ;;  %585 = vmatprep.mubr.f32.mxu0 %v2211_v6  ;;  %v451_v7 = vld [vmem:[%s2726_s3 + $0x8] sm:$0xff]  ;;  %v453_v8 = vld [vmem:[%s2726_s3 + $0x18] sm:$0xff]  ;;  %1924 = vmatprep.subr.bf16.mxu1 %v2212_v9  ;;  %vm517_vm1 = vcmask 130048   ;;  %s825_s17 = scalar_select %p394_p4, 1, 0 }
  0x18   : > { %v2337_v10 = vpack.c.bf16 %v446_v5, %v443_v3  ;;  %v2339_v11 = vpack.c.bf16 %v453_v8, %v451_v7  ;;  %v450_v12 = vld [vmem:[%s2726_s3] sm:$0xff]  ;;  %v452_v13 = vld [vmem:[%s2726_s3 + $0x10] sm:$0xff]  ;;  %1798 = vmatprep.mubr.msk.f32.mxu1 %vm2213_vm0, %v2211_v6  ;;  %v455_v14 = vld [vmem:[%s2726_s3 + $0x28] sm:$0xff]  ;;  %s1468_s25 = sadd.s32 2, %s2285_s13  ;;  %p1730_p8 = scmp.ne.s32.totalorder %s2201_s30, 2 }
  0x19   : > { %1921 = vmatprep.subr.bf16.mxu0 %v2324_v4  ;;  %v457_v15 = vld [vmem:[%s2726_s3 + $0x38] sm:$0xff]  ;;  %v500_v16 = vld [vmem:[%s2294_s18] sm:$0xff]  ;;  %v2358_v17 = vpack.c.bf16 %v452_v13, %v450_v12  ;;  %v456_v20 = vld [vmem:[%s2726_s3 + $0x30] sm:$0xff]  ;;  %s826_s19 = scvt.s32.f32 %s825_s17  ;;  %p1469_p7 = scmp.lt.s32.totalorder %s1468_s25, 8 }
  0x1a   : > { %1923 = vmatpush1.bf16.msra.mxu0 %v2337_v10  ;;  %v2361_v18 = vpack.c.bf16 %v457_v15, %v455_v14  ;;  %v454_v19 = vld [vmem:[%s2726_s3 + $0x20] sm:$0xff]  ;;  %v459_v21 = vld [vmem:[%s2726_s3 + $0x48] sm:$0xff]  ;;  %v461_v22 = vld [vmem:[%s2726_s3 + $0x58] sm:$0xff] }
  0x1b   : > { %1928 = vmatprep.subr.bf16.mxu0 %v2339_v11  ;;  %v2377_v23 = vpack.c.bf16 %v456_v20, %v454_v19  ;;  %v2381_v24 = vpack.c.bf16 %v461_v22, %v459_v21  ;;  %v458_v25 = vld [vmem:[%s2726_s3 + $0x40] sm:$0xff]  ;;  %v460_v26 = vld [vmem:[%s2726_s3 + $0x50] sm:$0xff]  ;;  %v463_v27 = vld [vmem:[%s2726_s3 + $0x68] sm:$0xff]  ;;  %s829_s20 = ssub.f32 1.0, %s826_s19 }
  0x1c   : > { %v465_v28 = vld [vmem:[%s2726_s3 + $0x78] sm:$0xff]  ;;  %v2396_v29 = vpack.c.bf16 %v460_v26, %v458_v25  ;;  %v445_v30 = vld [vmem:[%s2724_s1 + $0x10] sm:$0xff]  ;;  %v462_v32 = vld [vmem:[%s2726_s3 + $0x60] sm:$0xff]  ;;  %s1470_s26 = scalar_select %p1469_p7, 1, 0 }
  0x1d   : > { %1710 = vmatmul.mubr.msk.f32.vlgmr.msra.gmra.mrb[0].mxu0 %vm517_vm1, %v500_v16  ;;  %v2402_v31 = vpack.c.bf16 %v465_v28, %v463_v27  ;;  %v464_v33 = vld [vmem:[%s2726_s3 + $0x70] sm:$0xff]  ;;  %v448_v34 = vld [vmem:[%s2724_s1 + $0x28] sm:$0xff]  ;;  %v469_v36 = vld [vmem:[%s2726_s3 + $0x98] sm:$0xff] }
  0x1e   : > { %1930 = vmatpush1.bf16.msra.mxu0 %v2358_v17  ;;  %726 = vmatprep.mubr.f32.mxu0 %v2211_v6  ;;  %v467_v35 = vld [vmem:[%s2726_s3 + $0x88] sm:$0xff]  ;;  %v2419_v37 = vpack.c.bf16 %v448_v34, %v445_v30  ;;  %v2422_v38 = vpack.c.bf16 %v464_v33, %v462_v32  ;;  %v466_v40 = vld [vmem:[%s2726_s3 + $0x80] sm:$0xff]  ;;  %v468_v41 = vld [vmem:[%s2726_s3 + $0x90] sm:$0xff]  ;;  %v502_v34 = vlaneseq  ;;  %s1471_s28 = scvt.s32.f32 %s1470_s26 }
  0x1f   : > { %1932 = vmatprep.subr.bf16.mxu0 %v2361_v18  ;;  %v2426_v39 = vpack.c.bf16 %v469_v36, %v467_v35  ;;  %v471_v42 = vld [vmem:[%s2726_s3 + $0xa8] sm:$0xff]  ;;  %v473_v43 = vld [vmem:[%s2726_s3 + $0xb8] sm:$0xff]  ;;  %v2443_v44 = vpack.c.bf16 %v468_v41, %v466_v40  ;;  %v470_v46 = vld [vmem:[%s2726_s3 + $0xa0] sm:$0xff] }
  0x20   : > { %1926 = vmatpush3.bf16.msra.mxu1 %v2419_v37  ;;  %v2448_v45 = vpack.c.bf16 %v473_v43, %v471_v42  ;;  %v472_v47 = vld [vmem:[%s2726_s3 + $0xb0] sm:$0xff]  ;;  %v475_v48 = vld [vmem:[%s2726_s3 + $0xc8] sm:$0xff]  ;;  %v477_v49 = vld [vmem:[%s2726_s3 + $0xd8] sm:$0xff]  ;;  %v503_v35 = vshrl.u32 %v502_v34, 7  ;;  %s1474_s29 = ssub.f32 1.0, %s1471_s28 }
  0x21   : > { %1959 = vmatprep.subr.bf16.mxu1 %v2212_v9  ;;  %v2463_v50 = vpack.c.bf16 %v472_v47, %v470_v46  ;;  %v2466_v51 = vpack.c.bf16 %v477_v49, %v475_v48  ;;  %v474_v52 = vld [vmem:[%s2726_s3 + $0xc0] sm:$0xff]  ;;  %v476_v53 = vld [vmem:[%s2726_s3 + $0xd0] sm:$0xff]  ;;  %v479_v54 = vld [vmem:[%s2726_s3 + $0xe8] sm:$0xff] }
  0x22   : > { %1934 = vmatpush1.bf16.msra.mxu0 %v2377_v23  ;;  %v481_v55 = vld [vmem:[%s2726_s3 + $0xf8] sm:$0xff]  ;;  %v2481_v56 = vpack.c.bf16 %v476_v53, %v474_v52  ;;  %v478_v58 = vld [vmem:[%s2726_s3 + $0xe0] sm:$0xff]  ;;  %v480_v59 = vld [vmem:[%s2726_s3 + $0xf0] sm:$0xff]  ;;  %v504_v36 = vsub.s32 0, %v503_v35  ;;  %v508_v41 = vsub.s32 1, %v503_v35 }
  0x23   : > { %1936 = vmatprep.subr.bf16.mxu0 %v2381_v24  ;;  %1799 = vmatmul.mubr.msk.f32.vlgmr.msra.gmra.mrb[0].mxu1 %vm517_vm1, %v500_v16  ;;  %v2484_v57 = vpack.c.bf16 %v481_v55, %v479_v54  ;;  %v2493_v60 = vpack.c.bf16 %v480_v59, %v478_v58  ;;  %v2497_v61 = vld [vmem:[#allocation2] sm:$0xff]  ;;  %v483_v63 = vld [vmem:[%s2727_s4 + $0x8] sm:$0xff]  ;;  %v484_v1 = vld [vmem:[%s2727_s4 + $0x10] sm:$0xff] }
  0x24   : > { %1833 = vmatprep.mubr.msk.f32.mxu1 %vm2213_vm0, %v2211_v6  ;;  %v482_v62 = vld [vmem:[%s2727_s4] sm:$0xff]  ;;  %v485_v2 = vld [vmem:[%s2727_s4 + $0x18] sm:$0xff]  ;;  %v487_v7 = vld [vmem:[%s2727_s4 + $0x28] sm:$0xff] }
  0x25   : > { %v2510_v0 = vpack.c.bf16 %v483_v63, %v482_v62  ;;  %v2520_v3 = vpack.c.bf16 %v485_v2, %v484_v1  ;;  %v486_v5 = vld [vmem:[%s2727_s4 + $0x20] sm:$0xff]  ;;  %v488_v12 = vld [vmem:[%s2727_s4 + $0x30] sm:$0xff]  ;;  %v489_v13 = vld [vmem:[%s2727_s4 + $0x38] sm:$0xff]  ;;  %v512_v1 = vsub.s32 2, %v503_v35 }
  0x26   : > { %1938 = vmatpush1.bf16.msra.mxu0 %v2396_v29  ;;  %v2530_v8 = vpack.c.bf16 %v487_v7, %v486_v5  ;;  %v2540_v14 = vpack.c.bf16 %v489_v13, %v488_v12  ;;  %v490_v15 = vld [vmem:[%s2727_s4 + $0x40] sm:$0xff]  ;;  %v491_v16 = vld [vmem:[%s2727_s4 + $0x48] sm:$0xff]  ;;  %v492_v20 = vld [vmem:[%s2727_s4 + $0x50] sm:$0xff] }
  0x27   : > { %1940 = vmatprep.subr.bf16.mxu0 %v2402_v31  ;;  %1961 = vmatpush3.bf16.msra.mxu1 %v2510_v0  ;;  %v2550_v19 = vpack.c.bf16 %v491_v16, %v490_v15  ;;  %v493_v21 = vld [vmem:[%s2727_s4 + $0x58] sm:$0xff]  ;;  %v494_v25 = vld [vmem:[%s2727_s4 + $0x60] sm:$0xff]  ;;  %v495_v26 = vld [vmem:[%s2727_s4 + $0x68] sm:$0xff]  ;;  %v830_v16 = vstv %s829_s20 }
  0x28   : > { %1962 = vmatprep.subr.bf16.mxu1 %v2212_v9  ;;  %v2560_v22 = vpack.c.bf16 %v493_v21, %v492_v20  ;;  %v2570_v27 = vpack.c.bf16 %v495_v26, %v494_v25  ;;  %v496_v28 = vld [vmem:[%s2727_s4 + $0x70] sm:$0xff]  ;;  %v497_v30 = vld [vmem:[%s2727_s4 + $0x78] sm:$0xff]  ;;  %v1714_v33 = vld [vmem:[%s2294_s18 + $0x8] sm:$0xff]  ;;  %v827_v25 = vstv %s826_s19  ;;  %v831_v26 = vmul.f32 %v830_v16, %v2497_v61 }
  0x29   : > { %v2580_v32 = vpack.c.bf16 %v497_v30, %v496_v28  ;;  %v449_v40 = vld [vmem:[%s2725_s2] sm:$0x7]  ;;  %v1722_v34 = vld [vmem:[%s2294_s18 + $0x10] sm:$0xff]  ;;  %s1144_s18 = sadd.s32 1, %s2285_s13 }
  0x2a   : > { %1942 = vmatpush1.bf16.msra.mxu0 %v2422_v38  ;;  %v2606_v42 = vrot.slane %v449_v40, %v504_v36  ;;  %v2608_v43 = vrot.slane %v449_v40, %v508_v41  ;;  %v2638_v2 = vrot.slane %v449_v40, %v512_v1  ;;  %p1145_p6 = scmp.lt.s32.totalorder %s1144_s18, 8 }
  0x2b   : > { %1944 = vmatprep.subr.bf16.mxu0 %v2426_v39  ;;  %1964 = vmatpush3.bf16.msra.mxu1 %v2520_v3 }
  0x2c   : > { %1965 = vmatprep.subr.bf16.mxu1 %v2212_v9  ;;  %s1146_s15 = scalar_select %p1145_p6, 1, 0 }
  0x2e   : > { %1946 = vmatpush1.bf16.msra.mxu0 %v2443_v44  ;;  %s1147_s22 = scvt.s32.f32 %s1146_s15 }
  0x2f   : > { %1948 = vmatprep.subr.bf16.mxu0 %v2448_v45  ;;  %1967 = vmatpush3.bf16.msra.mxu1 %v2530_v8 }
  0x30   : > { %1968 = vmatprep.subr.bf16.mxu1 %v2212_v9  ;;  %s1150_s23 = ssub.f32 1.0, %s1147_s22 }
  0x32   : > { %1950 = vmatpush1.bf16.msra.mxu0 %v2463_v50 }
  0x33   : > { %1952 = vmatprep.subr.bf16.mxu0 %v2466_v51  ;;  %1970 = vmatpush3.bf16.msra.mxu1 %v2540_v14 }
  0x34   : > { %1971 = vmatprep.subr.bf16.mxu1 %v2212_v9 }
  0x36   : > { %1954 = vmatpush1.bf16.msra.mxu0 %v2481_v56 }
  0x37   : > { %1956 = vmatprep.subr.bf16.mxu0 %v2484_v57  ;;  %1973 = vmatpush3.bf16.msra.mxu1 %v2550_v19 }
  0x38   : > { %1974 = vmatprep.subr.bf16.mxu1 %v2212_v9 }
  0x3a   : > { %1958 = vmatpush1.bf16.msra.mxu0 %v2493_v60 }
  0x3b   : > { %1984 = vmatprep.subr.bf16.mxu0 %v2324_v4  ;;  %1976 = vmatpush3.bf16.msra.mxu1 %v2560_v22 }
  0x3c   : > { %1977 = vmatprep.subr.bf16.mxu1 %v2212_v9 }
  0x3d   : > { %727 = vmatmul.mubr.f32.vlgmr.msra.gmra.mrb[0].mxu0 %v2497_v61 }
  0x3e   : > { %1986 = vmatpush1.bf16.msra.mxu0 %v2337_v10  ;;  %905 = vmatprep.mubr.f32.mxu0 %v2211_v6 }
  0x3f   : > { %1991 = vmatprep.subr.bf16.mxu0 %v2339_v11  ;;  %1979 = vmatpush3.bf16.msra.mxu1 %v2570_v27 }
  0x40   : > { %1980 = vmatprep.subr.bf16.mxu1 %v2212_v9 }
  0x41   : > { %1715 = vmatmul.mubr.msk.f32.vlgmr.msra.gmra.mrb[2].mxu0 %vm517_vm1, %v1714_v33 }
  0x42   : > { %1993 = vmatpush1.bf16.msra.mxu0 %v2358_v17  ;;  %1046 = vmatprep.mubr.f32.mxu0 %v2211_v6 }
  0x43   : > { %1982 = vmatpush3.bf16.msra.mxu1 %v2580_v32  ;;  %1995 = vmatprep.subr.bf16.mxu0 %v2361_v18 }
  0x44   : > { %1987 = vmatprep.subr.bf16.mxu1 %v2212_v9 }
  0x46   : > { %1997 = vmatpush1.bf16.msra.mxu0 %v2377_v23 }
  0x47   : > { %1999 = vmatprep.subr.bf16.mxu0 %v2381_v24 }
  0x4a   : > { %2001 = vmatpush1.bf16.msra.mxu0 %v2396_v29 }
  0x4b   : > { %2003 = vmatprep.subr.bf16.mxu0 %v2402_v31 }
  0x4e   : > { %2005 = vmatpush1.bf16.msra.mxu0 %v2422_v38 }
  0x4f   : > { %2007 = vmatprep.subr.bf16.mxu0 %v2426_v39 }
  0x52   : > { %2009 = vmatpush1.bf16.msra.mxu0 %v2443_v44 }
  0x53   : > { %2011 = vmatprep.subr.bf16.mxu0 %v2448_v45 }
  0x56   : > { %2013 = vmatpush1.bf16.msra.mxu0 %v2463_v50 }
  0x57   : > { %2015 = vmatprep.subr.bf16.mxu0 %v2466_v51 }
  0x5a   : > { %2017 = vmatpush1.bf16.msra.mxu0 %v2481_v56 }
  0x5b   : > { %2019 = vmatprep.subr.bf16.mxu0 %v2484_v57 }
  0x5e   : > { %2021 = vmatpush1.bf16.msra.mxu0 %v2493_v60 }
  0x5f   : > { %2047 = vmatprep.subr.bf16.mxu0 %v2324_v4 }
 0x110   : > { %v728_v46 = vpop.f32.mrb[0].mxu0 }
 0x111   : > { %v2109_v47 = vadd.f32 %v728_v46, %v2606_v42  ;;  %v730_v48 = vpop.f32.mrb[1].mxu0 }
 0x112   : > { %v2110_v4 = vadd.f32 %v730_v48, %v2608_v43 }
 0x113   : > { %v1712_v49 = vmul.f32 -1.442695, %v2109_v47 }
 0x114   : > { %v1713_v52 = vmul.f32 -1.442695, %v2110_v4 }
 0x115   : > { %2157 = vpow2.f32 %v1712_v49 }
 0x116   : > { %2159 = vpow2.f32 %v1713_v52 }
 0x11f   : > { %v2158_v53 = vpop.eup %2157 }
 0x120   : > { %v2160_v54 = vpop.eup %2159  ;;  %v737_v55 = vadd.f32 1.0, %v2158_v53 }
 0x121   : > { %v744_v58 = vadd.f32 1.0, %v2160_v54 }
 0x122   : > { %2161 = vrcp.f32 %v737_v55 }
 0x123   : > { %2163 = vrcp.f32 %v744_v58 }
 0x12c   : > { %v2162_v59 = vpop.eup %2161 }
 0x12d   : > { %v2164_v62 = vpop.eup %2163  ;;  %833 = vst [vmem:[%s2299_s21] sm:$0xff] %v2162_v59  ;;  %v820_v13 = vsub.f32 1.0, %v2162_v59 }
 0x12e   : > { %834 = vst [vmem:[%s2304_s24] sm:$0xff] %v2164_v62  ;;  %v747_v63 = vmul.f32 %v2164_v62, %v2497_v61  ;;  %v1472_v62 = vstv %s1471_s28 }
 0x12f   : > { %v821_v20 = vmul.f32 %v820_v13, %v2497_v61 }
 0x130   : > { %1834 = vmatmul.mubr.f32.vlgmr.msra.gmra.mrb[0].mxu1 %v747_v63  ;;  %v1475_v63 = vstv %s1474_s29 }
 0x131   : > { %1989 = vmatpush3.bf16.msra.mxu1 %v2419_v37  ;;  %1840 = vmatprep.mubr.msk.f32.mxu1 %vm2213_vm0, %v2211_v6 }
 0x132   : > { %2022 = vmatprep.subr.bf16.mxu1 %v2212_v9 }
 0x134   : > { %1841 = vmatmul.mubr.msk.f32.vlgmr.msra.gmra.mrb[2].mxu1 %vm517_vm1, %v1714_v33 }
 0x135   : > { %2024 = vmatpush3.bf16.msra.mxu1 %v2510_v0  ;;  %1875 = vmatprep.mubr.msk.f32.mxu1 %vm2213_vm0, %v2211_v6 }
 0x136   : > { %2025 = vmatprep.subr.bf16.mxu1 %v2212_v9 }
 0x139   : > { %2027 = vmatpush3.bf16.msra.mxu1 %v2520_v3 }
 0x13a   : > { %2028 = vmatprep.subr.bf16.mxu1 %v2212_v9 }
 0x13d   : > { %2030 = vmatpush3.bf16.msra.mxu1 %v2530_v8 }
 0x13e   : > { %2031 = vmatprep.subr.bf16.mxu1 %v2212_v9 }
 0x141   : > { %2033 = vmatpush3.bf16.msra.mxu1 %v2540_v14 }
 0x142   : > { %2034 = vmatprep.subr.bf16.mxu1 %v2212_v9 }
 0x145   : > { %2036 = vmatpush3.bf16.msra.mxu1 %v2550_v19 }
 0x146   : > { %2037 = vmatprep.subr.bf16.mxu1 %v2212_v9 }
 0x149   : > { %2039 = vmatpush3.bf16.msra.mxu1 %v2560_v22 }
 0x14a   : > { %2040 = vmatprep.subr.bf16.mxu1 %v2212_v9 }
 0x14d   : > { %2042 = vmatpush3.bf16.msra.mxu1 %v2570_v27 }
 0x14e   : > { %2043 = vmatprep.subr.bf16.mxu1 %v2212_v9 }
 0x151   : > { %2045 = vmatpush3.bf16.msra.mxu1 %v2580_v32 }
 0x152   : > { %2050 = vmatprep.subr.bf16.mxu1 %v2212_v9 }
 0x203   : > { %v814_v5 = vpop.f32.mrb[0].mxu1 }
 0x204   : > { %v2111_v7 = vadd.f32 %v814_v5, %v2638_v2  ;;  %v1835_v12 = vpop.f32.mrb[1].mxu1 }
 0x206   : > { %2165 = vtanh.f32 %v2111_v7 }
 0x210   : > { %v2166_v15 = vpop.eup %2165 }
 0x211   : > { %v822_v21 = vmul.f32 %v2166_v15, %v2162_v59 }
 0x213   : > { %v823_v28 = vadd.f32 %v822_v21, %v821_v20 }
 0x215   : > { %v828_v30 = vmul.f32 %v827_v25, %v823_v28 }
 0x217   : > { %v2645_v33 = vadd.f32 %v831_v26, %v828_v30 }
 0x219   : > { %835 = vst [vmem:[%s2309_s27] sm:$0xff] %v2645_v33  ;;  %1047 = vmatmul.mubr.f32.vlgmr.msra.gmra.mrb[2].mxu0 %v2645_v33 }
 0x21a   : > { %2049 = vmatpush1.bf16.msra.mxu0 %v2337_v10  ;;  %1229 = vmatprep.mubr.f32.mxu0 %v2211_v6 }
 0x21b   : > { %2054 = vmatprep.subr.bf16.mxu0 %v2339_v11 }
 0x21d   : > { %1723 = vmatmul.mubr.msk.f32.vlgmr.msra.gmra.mrb[4].mxu0 %vm517_vm1, %v1722_v34 }
 0x21e   : > { %2056 = vmatpush1.bf16.msra.mxu0 %v2358_v17  ;;  %1370 = vmatprep.mubr.f32.mxu0 %v2211_v6 }
 0x21f   : > { %2058 = vmatprep.subr.bf16.mxu0 %v2361_v18 }
 0x222   : > { %2060 = vmatpush1.bf16.msra.mxu0 %v2377_v23 }
 0x223   : > { %2062 = vmatprep.subr.bf16.mxu0 %v2381_v24 }
 0x226   : > { %2064 = vmatpush1.bf16.msra.mxu0 %v2396_v29 }
 0x227   : > { %2066 = vmatprep.subr.bf16.mxu0 %v2402_v31 }
 0x22a   : > { %2068 = vmatpush1.bf16.msra.mxu0 %v2422_v38 }
 0x22b   : > { %2070 = vmatprep.subr.bf16.mxu0 %v2426_v39 }
 0x22e   : > { %2072 = vmatpush1.bf16.msra.mxu0 %v2443_v44 }
 0x22f   : > { %2074 = vmatprep.subr.bf16.mxu0 %v2448_v45 }
 0x232   : > { %2076 = vmatpush1.bf16.msra.mxu0 %v2463_v50 }
 0x233   : > { %2078 = vmatprep.subr.bf16.mxu0 %v2466_v51 }
 0x236   : > { %2080 = vmatpush1.bf16.msra.mxu0 %v2481_v56 }
 0x237   : > { %2082 = vmatprep.subr.bf16.mxu0 %v2484_v57 }
 0x23a   : > { %2084 = vmatpush1.bf16.msra.mxu0 %v2493_v60 }
 0x2ec   : > { %v1048_v10 = vpop.f32.mrb[2].mxu0 }
 0x2ed   : > { %v2112_v11 = vadd.f32 %v1048_v10, %v2606_v42  ;;  %v1050_v17 = vpop.f32.mrb[3].mxu0 }
 0x2ee   : > { %v2113_v18 = vadd.f32 %v1050_v17, %v2608_v43 }
 0x2ef   : > { %v1717_v23 = vmul.f32 -1.442695, %v2112_v11 }
 0x2f0   : > { %v1718_v24 = vmul.f32 -1.442695, %v2113_v18 }
 0x2f1   : > { %2167 = vpow2.f32 %v1717_v23 }
 0x2f2   : > { %2169 = vpow2.f32 %v1718_v24 }
 0x2fb   : > { %v2168_v29 = vpop.eup %2167 }
 0x2fc   : > { %v2170_v31 = vpop.eup %2169  ;;  %v1057_v38 = vadd.f32 1.0, %v2168_v29 }
 0x2fd   : > { %v1064_v39 = vadd.f32 1.0, %v2170_v31 }
 0x2fe   : > { %2171 = vrcp.f32 %v1057_v38 }
 0x2ff   : > { %2173 = vrcp.f32 %v1064_v39 }
 0x308   : > { %v2172_v44 = vpop.eup %2171 }
 0x309   : > { %v2174_v45 = vpop.eup %2173  ;;  %1719 = vst [vmem:[%s2299_s21 + $0x8] sm:$0xff] %v2172_v44  ;;  %v1140_v56 = vsub.f32 1.0, %v2172_v44 }
 0x30a   : > { %1720 = vst [vmem:[%s2304_s24 + $0x8] sm:$0xff] %v2174_v45  ;;  %v1067_v50 = vmul.f32 %v2174_v45, %v2645_v33 }
 0x30b   : > { %v1141_v60 = vmul.f32 %v1140_v56, %v2645_v33 }
 0x30c   : > { %1876 = vmatmul.mubr.f32.vlgmr.msra.gmra.mrb[2].mxu1 %v1067_v50 }
 0x30d   : > { %2052 = vmatpush3.bf16.msra.mxu1 %v2419_v37  ;;  %1882 = vmatprep.mubr.msk.f32.mxu1 %vm2213_vm0, %v2211_v6 }
 0x30e   : > { %2085 = vmatprep.subr.bf16.mxu1 %v2212_v9 }
 0x310   : > { %1883 = vmatmul.mubr.msk.f32.vlgmr.msra.gmra.mrb[4].mxu1 %vm517_vm1, %v1722_v34 }
 0x311   : > { %2087 = vmatpush3.bf16.msra.mxu1 %v2510_v0  ;;  %1917 = vmatprep.mubr.msk.f32.mxu1 %vm2213_vm0, %v2211_v6  ;;  %v1148_v0 = vstv %s1147_s22 }
 0x312   : > { %2088 = vmatprep.subr.bf16.mxu1 %v2212_v9 }
 0x315   : > { %2090 = vmatpush3.bf16.msra.mxu1 %v2520_v3 }
 0x316   : > { %2091 = vmatprep.subr.bf16.mxu1 %v2212_v9 }
 0x319   : > { %2093 = vmatpush3.bf16.msra.mxu1 %v2530_v8 }
 0x31a   : > { %2094 = vmatprep.subr.bf16.mxu1 %v2212_v9 }
 0x31d   : > { %2096 = vmatpush3.bf16.msra.mxu1 %v2540_v14 }
 0x31e   : > { %2097 = vmatprep.subr.bf16.mxu1 %v2212_v9 }
 0x321   : > { %2099 = vmatpush3.bf16.msra.mxu1 %v2550_v19 }
 0x322   : > { %2100 = vmatprep.subr.bf16.mxu1 %v2212_v9 }
 0x325   : > { %2102 = vmatpush3.bf16.msra.mxu1 %v2560_v22 }
 0x326   : > { %2103 = vmatprep.subr.bf16.mxu1 %v2212_v9 }
 0x329   : > { %2105 = vmatpush3.bf16.msra.mxu1 %v2570_v27 }
 0x32a   : > { %2106 = vmatprep.subr.bf16.mxu1 %v2212_v9  ;;  %v1151_v9 = vstv %s1150_s23 }
 0x32b   : > { %v1152_v14 = vmul.f32 %v1151_v9, %v2645_v33 }
 0x32d   : > { %2108 = vmatpush3.bf16.msra.mxu1 %v2580_v32 }
 0x3df   : > { %v1134_v6 = vpop.f32.mrb[2].mxu1 }
 0x3e0   : > { %v2114_v37 = vadd.f32 %v1134_v6, %v2638_v2  ;;  %v1877_v51 = vpop.f32.mrb[3].mxu1 }
 0x3e2   : > { %2175 = vtanh.f32 %v2114_v37 }
 0x3ec   : > { %v2176_v57 = vpop.eup %2175 }
 0x3ed   : > { %v1142_v61 = vmul.f32 %v2176_v57, %v2172_v44 }
 0x3ef   : > { %v1143_v3 = vadd.f32 %v1142_v61, %v1141_v60 }
 0x3f1   : > { %v1149_v8 = vmul.f32 %v1148_v0, %v1143_v3 }
 0x3f3   : > { %v1153_v19 = vadd.f32 %v1152_v14, %v1149_v8 }
 0x3f5   : > { %1721 = vst [vmem:[%s2309_s27 + $0x8] sm:$0xff] %v1153_v19  ;;  %1371 = vmatmul.mubr.f32.vlgmr.msra.gmra.mrb[4].mxu0 %v1153_v19  ;;  %v1476_v7 = vmul.f32 %v1475_v63, %v1153_v19 }
 0x4c8   : > { %v1372_v22 = vpop.f32.mrb[4].mxu0 }
 0x4c9   : > { %v2115_v27 = vadd.f32 %v1372_v22, %v2606_v42  ;;  %v1374_v32 = vpop.f32.mrb[5].mxu0 }
 0x4ca   : > { %v2116_v35 = vadd.f32 %v1374_v32, %v2608_v43 }
 0x4cb   : > { %v1725_v36 = vmul.f32 -1.442695, %v2115_v27 }
 0x4cc   : > { %v1726_v40 = vmul.f32 -1.442695, %v2116_v35 }
 0x4cd   : > { %2177 = vpow2.f32 %v1725_v36 }
 0x4ce   : > { %2179 = vpow2.f32 %v1726_v40 }
 0x4d7   : > { %v2178_v41 = vpop.eup %2177 }
 0x4d8   : > { %v2180_v46 = vpop.eup %2179  ;;  %v1381_v47 = vadd.f32 1.0, %v2178_v41 }
 0x4d9   : > { %v1388_v48 = vadd.f32 1.0, %v2180_v46 }
 0x4da   : > { %2181 = vrcp.f32 %v1381_v47 }
 0x4db   : > { %2183 = vrcp.f32 %v1388_v48 }
 0x4e4   : > { %v2182_v4 = vpop.eup %2181 }
 0x4e5   : > { %v2184_v49 = vpop.eup %2183  ;;  %1727 = vst [vmem:[%s2299_s21 + $0x10] sm:$0xff] %v2182_v4  ;;  %v1464_v54 = vsub.f32 1.0, %v2182_v4 }
 0x4e6   : > { %1728 = vst [vmem:[%s2304_s24 + $0x10] sm:$0xff] %v2184_v49  ;;  %v1391_v42 = vmul.f32 %v2184_v49, %v1153_v19 }
 0x4e7   : > { %v1465_v58 = vmul.f32 %v1464_v54, %v1153_v19 }
 0x4e8   : > { %1918 = vmatmul.mubr.f32.vlgmr.msra.gmra.mrb[4].mxu1 %v1391_v42 }
 0x5bb   : > { %v1458_v43 = vpop.f32.mrb[4].mxu1 }
 0x5bc   : > { %v2117_v52 = vadd.f32 %v1458_v43, %v2638_v2  ;;  %v1919_v53 = vpop.f32.mrb[5].mxu1 }
 0x5be   : > { %2185 = vtanh.f32 %v2117_v52 }
 0x5c8   : > { %v2186_v55 = vpop.eup %2185 }
 0x5c9   : > { %v1466_v59 = vmul.f32 %v2186_v55, %v2182_v4 }
 0x5cb   : > { %v1467_v1 = vadd.f32 %v1466_v59, %v1465_v58  ;;  %1488 = sbr.rel (%p1730_p8) target bundleno = 1491 (0x5d3), region = 52 }
 0x5cd   : > { %v1473_v5 = vmul.f32 %v1472_v62, %v1467_v1 }
 0x5cf   : > { %v1477_v12 = vadd.f32 %v1476_v7, %v1473_v5 }
 0x5d1   : > { %1729 = vst [vmem:[%s2309_s27 + $0x10] sm:$0xff] %v1477_v12  ;;  %1484 = vst [vmem:[#allocation2] sm:$0xff] %v1477_v12 }
 0x5d2   : > { %1489 = vst [vmem:[%s2732_s9] sm:$0xff] %v1477_v12 }
 0x5d3 PF: > { %s20_s11 = sadd.s32 1, %s2209_s11   ;;  %s2733_s30 = smov %s2205_s10 }
 0x5d4   : > { %p17_p9 = scmp.ge.s32.totalorder %s20_s11, 5   ;;  %s2734_s10 = smov %s2736_s12 }
 0x5d6   :  { %19 = sbr.rel (!%p17_p9) target bundleno = 2 (0x2), region = 129 }

</bundles_post_ra>
